<compile_context>
chip_gen: v5e
topology: v5e:2x2
jax: 0.10.0
libtpu: 0.0.40
codegen_flags: <defaults>
</compile_context>

<pallas_src>
import jax
import jax.numpy as jnp
from jax.experimental import pallas as pl
from jax.experimental.pallas import tpu as pltpu

# ---------------- problem sizes (small, synthetic) ----------------
B = 2            # batch per view
C_IN = 4         # input channels
H = W = 16       # spatial
KH = KW = 3      # conv kernel (3x3, pad=1)
C_CONV = 8       # conv output channels (== pooled feature dim)
HID = 32         # encoder output dim (h)
PROJ = 16        # projection dim (z)
P = H * W        # valid pixels per image (256)
K = KH * KW * C_IN          # 36
K_PAD = 48                  # padded im2col depth (multiple of 16 for bf16 tiles)
N_IMGS = 2 * B              # both views fused -> 4 images
N_PIX = N_IMGS * P          # 1024 lanes, per-image contiguous 256-lane segments

# ---------------- parameter-blob layout (one f32 (32,128) input) ----------------
PB_ROWS = HID               # 32
PB_COLS = 128
COL_W2T = 0                 # (32, 32)
COL_W3T = 32                # rows 0:16  -> (16, 32)
COL_W1T = 64                # (32, 8)
COL_CWT = 72                # rows 0:8   -> (8, 48) (cols 36:48 zero)
COL_B1 = 120                # (32, 1)
COL_B2 = 121                # (32, 1)
COL_B3 = 122                # rows 0:16
COL_CB = 123                # rows 0:8


def simclr_kernel(patches_ref, mask_ref, params_ref, z_ref):
    """Fused conv + global-avg-pool + encoder MLP + projection head, both views."""
    params = params_ref[...]                                    # (32, 128) f32

    # ---- conv: ONE bf16 MXU matmul over the whole im2col matrix ----
    cwt = params[:C_CONV, COL_CWT:COL_CWT + K_PAD].astype(jnp.bfloat16)   # (8, 48)
    conv = jnp.dot(cwt, patches_ref[...],
                   preferred_element_type=jnp.float32)          # (8, 1024) f32
    cb = params[:C_CONV, COL_CB:COL_CB + 1]                     # (8, 1)
    a = jnp.maximum(conv + cb, 0.0)                             # bias + ReLU (f32)

    # ---- global average pool: one matmul with the precomputed (N_PIX, N_IMGS)
    #      mask (entries 1/P); no in-kernel iota/mask build, no transpose ----
    pooled = jnp.dot(a, mask_ref[...],
                     preferred_element_type=jnp.float32)        # (8, 4)

    # ---- encoder linear + projection head (images stay on the lane axis) ----
    w1t = params[:, COL_W1T:COL_W1T + C_CONV]                   # (32, 8)
    b1 = params[:, COL_B1:COL_B1 + 1]                           # (32, 1)
    w2t = params[:, COL_W2T:COL_W2T + HID]                      # (32, 32)
    b2 = params[:, COL_B2:COL_B2 + 1]                           # (32, 1)
    w3t = params[:PROJ, COL_W3T:COL_W3T + HID]                  # (16, 32)
    b3 = params[:PROJ, COL_B3:COL_B3 + 1]                       # (16, 1)

    h = jnp.maximum(jnp.dot(w1t, pooled,
                            preferred_element_type=jnp.float32) + b1, 0.0)   # (32, 4)
    g = jnp.maximum(jnp.dot(w2t, h,
                            preferred_element_type=jnp.float32) + b2, 0.0)   # (32, 4)
    z = jnp.dot(w3t, g, preferred_element_type=jnp.float32) + b3             # (16, 4)
    z_ref[...] = z.astype(z_ref.dtype)


# ---------------- wrapper-side layout plumbing ----------------
def _im2col_patches(x1_nchw, x2_nchw):
    """Valid-only im2col for both views: (K_PAD, N_PIX) bf16, per-image contiguous."""
    xs = jnp.concatenate([x1_nchw, x2_nchw], axis=0)            # (4, 4, 16, 16)
    xp = jnp.pad(xs, ((0, 0), (0, 0), (1, 1), (1, 1)))          # (4, 4, 18, 18)
    taps = [xp[:, :, dh:dh + H, dw:dw + W]
            for dh in range(KH) for dw in range(KW)]            # 9 x (4, 4, 16, 16)
    pat = jnp.stack(taps, axis=1)                               # (4, 9, 4, 16, 16)
    pat = pat.reshape(N_IMGS, K, P)                             # k = tap*C_IN + c
    pat = jnp.transpose(pat, (1, 0, 2)).reshape(K, N_PIX)       # (36, 1024)
    pat = jnp.pad(pat, ((0, K_PAD - K), (0, 0)))                # (48, 1024)
    return pat.astype(jnp.bfloat16)


def _pool_mask():
    """(N_PIX, N_IMGS) f32: mask[p, i] = (p // P == i) / P — pre-transposed."""
    eye = jnp.eye(N_IMGS, dtype=jnp.float32) / P
    return jnp.repeat(eye, P, axis=0)                           # (1024, 4)


def _pack_params(params):
    """Pack all 8 parameter tensors into one (32, 128) f32 blob."""
    conv_w, conv_b, w1, b1, w2, b2, w3, b3 = params
    cwt = conv_w.reshape(K, C_CONV).T                           # (8, 36)
    blob = jnp.zeros((PB_ROWS, PB_COLS), jnp.float32)
    blob = blob.at[:, COL_W2T:COL_W2T + HID].set(w2.T)
    blob = blob.at[:PROJ, COL_W3T:COL_W3T + HID].set(w3.T)
    blob = blob.at[:, COL_W1T:COL_W1T + C_CONV].set(w1.T)
    blob = blob.at[:C_CONV, COL_CWT:COL_CWT + K].set(cwt)
    blob = blob.at[:, COL_B1].set(b1)
    blob = blob.at[:, COL_B2].set(b2)
    blob = blob.at[:PROJ, COL_B3].set(b3)
    blob = blob.at[:C_CONV, COL_CB].set(conv_b)
    return blob


@jax.jit
def simclr_forward(x1_nchw, x2_nchw, params):
    """x1, x2: (B, C_IN, H, W) float32 — PyTorch NCHW convention."""
    patches = _im2col_patches(x1_nchw, x2_nchw)                 # (48, 1024) bf16
    mask = _pool_mask()                                         # (1024, 4) f32
    blob = _pack_params(params)                                 # (32, 128) f32

    vmem = pl.BlockSpec(memory_space=pltpu.MemorySpace.VMEM)
    z = pl.pallas_call(
        simclr_kernel,
        out_shape=jax.ShapeDtypeStruct((PROJ, N_IMGS), jnp.float32),
        in_specs=[vmem, vmem, vmem],
        out_specs=vmem,
    )(patches, mask, blob)
    zt = z.T                                                    # (2B, PROJ)
    return zt[:B], zt[B:]


def init_params(key):
    ks = jax.random.split(key, 8)
    s = 0.1
    conv_w = s * jax.random.normal(ks[0], (KH, KW, C_IN, C_CONV), jnp.float32)
    conv_b = s * jax.random.normal(ks[1], (C_CONV,), jnp.float32)
    w1 = s * jax.random.normal(ks[2], (C_CONV, HID), jnp.float32)
    b1 = s * jax.random.normal(ks[3], (HID,), jnp.float32)
    w2 = s * jax.random.normal(ks[4], (HID, HID), jnp.float32)
    b2 = s * jax.random.normal(ks[5], (HID,), jnp.float32)
    w3 = s * jax.random.normal(ks[6], (HID, PROJ), jnp.float32)
    b3 = s * jax.random.normal(ks[7], (PROJ,), jnp.float32)
    return (conv_w, conv_b, w1, b1, w2, b2, w3, b3)


# ---------------- pure-JAX (f32) reference for correctness ----------------
def _im2col_3x3_pad1(x_nhwc):
    b, h, w, c = x_nhwc.shape
    xp = jnp.pad(x_nhwc, ((0, 0), (1, 1), (1, 1), (0, 0)))
    taps = [xp[:, dh:dh + h, dw:dw + w, :] for dh in range(KH) for dw in range(KW)]
    return jnp.stack(taps, axis=3).reshape(b * h * w, KH * KW * c)


def reference_forward(x1_nchw, x2_nchw, params):
    conv_w, conv_b, w1, b1, w2, b2, w3, b3 = params
    cw = conv_w.reshape(K, C_CONV)

    def enc_proj(x):
        patches = _im2col_3x3_pad1(jnp.transpose(x, (0, 2, 3, 1)))
        conv = jnp.maximum(patches @ cw + conv_b, 0.0).reshape(B, P, C_CONV)
        pooled = conv.mean(axis=1)
        h = jnp.maximum(pooled @ w1 + b1, 0.0)
        g = jnp.maximum(h @ w2 + b2, 0.0)
        return g @ w3 + b3

    return enc_proj(x1_nchw), enc_proj(x2_nchw)


if __name__ == "__main__":
    key = jax.random.PRNGKey(0)
    k1, k2, kp = jax.random.split(key, 3)
    x1 = jax.random.normal(k1, (B, C_IN, H, W), jnp.float32)   # NCHW, like PyTorch
    x2 = jax.random.normal(k2, (B, C_IN, H, W), jnp.float32)
    params = init_params(kp)

    z1, z2 = simclr_forward(x1, x2, params)
    jax.block_until_ready((z1, z2))

    r1, r2 = reference_forward(x1, x2, params)
    # bf16 MXU operands on the conv (f32 accumulation) -> compare with a loose tol.
    assert jnp.allclose(z1, r1, atol=2e-2, rtol=2e-2)
    assert jnp.allclose(z2, r2, atol=2e-2, rtol=2e-2)

    print("KERNEL_OK")
</pallas_src>

<mosaic_0001>
module attributes {stable_mosaic.version = 11 : i64} {
  func.func @simclr_kernel(%arg0: memref<48x1024xbf16, #tpu.memory_space<vmem>>, %arg1: memref<1024x4xf32, #tpu.memory_space<vmem>>, %arg2: memref<32x128xf32, #tpu.memory_space<vmem>>, %arg3: memref<16x4xf32, #tpu.memory_space<vmem>>) attributes {dimension_semantics = [], scalar_prefetch = 0 : i64, scratch_operands = 0 : i64, tpu.core_type = #tpu.core_type<tc>} {
    %c0 = arith.constant 0 : index
    %c0_0 = arith.constant 0 : index
    %0 = vector.load %arg2[%c0, %c0_0] : memref<32x128xf32, #tpu.memory_space<vmem>>, vector<32x128xf32>
    %1 = vector.extract_strided_slice %0 {offsets = [0, 72], sizes = [8, 48], strides = [1, 1]} : vector<32x128xf32> to vector<8x48xf32>
    %2 = arith.truncf %1 : vector<8x48xf32> to vector<8x48xbf16>
    %c0_1 = arith.constant 0 : index
    %c0_2 = arith.constant 0 : index
    %3 = vector.load %arg0[%c0_1, %c0_2] : memref<48x1024xbf16, #tpu.memory_space<vmem>>, vector<48x1024xbf16>
    %cst = arith.constant dense<0.000000e+00> : vector<8x1024xf32>
    %4 = tpu.matmul %2, %3, %cst {dimension_numbers = #tpu.dot_dimension_numbers<[1], [0], [0], [1], [0, 0, 1, 1], [], []>} : vector<8x48xbf16>, vector<48x1024xbf16>, vector<8x1024xf32> -> vector<8x1024xf32>
    %5 = vector.extract_strided_slice %0 {offsets = [0, 123], sizes = [8, 1], strides = [1, 1]} : vector<32x128xf32> to vector<8x1xf32>
    %6 = vector.broadcast %5 : vector<8x1xf32> to vector<8x1024xf32>
    %7 = arith.addf %4, %6 : vector<8x1024xf32>
    %cst_3 = arith.constant 0.000000e+00 : f32
    %8 = vector.broadcast %cst_3 : f32 to vector<8x1024xf32>
    %9 = arith.maximumf %7, %8 : vector<8x1024xf32>
    %c0_4 = arith.constant 0 : index
    %c0_5 = arith.constant 0 : index
    %10 = vector.load %arg1[%c0_4, %c0_5] : memref<1024x4xf32, #tpu.memory_space<vmem>>, vector<1024x4xf32>
    %cst_6 = arith.constant dense<0.000000e+00> : vector<8x4xf32>
    %11 = tpu.matmul %9, %10, %cst_6 {dimension_numbers = #tpu.dot_dimension_numbers<[1], [0], [0], [1], [0, 0, 1, 1], [], []>} : vector<8x1024xf32>, vector<1024x4xf32>, vector<8x4xf32> -> vector<8x4xf32>
    %12 = vector.extract_strided_slice %0 {offsets = [0, 64], sizes = [32, 8], strides = [1, 1]} : vector<32x128xf32> to vector<32x8xf32>
    %13 = vector.extract_strided_slice %0 {offsets = [0, 120], sizes = [32, 1], strides = [1, 1]} : vector<32x128xf32> to vector<32x1xf32>
    %14 = vector.extract_strided_slice %0 {offsets = [0, 0], sizes = [32, 32], strides = [1, 1]} : vector<32x128xf32> to vector<32x32xf32>
    %15 = vector.extract_strided_slice %0 {offsets = [0, 121], sizes = [32, 1], strides = [1, 1]} : vector<32x128xf32> to vector<32x1xf32>
    %16 = vector.extract_strided_slice %0 {offsets = [0, 32], sizes = [16, 32], strides = [1, 1]} : vector<32x128xf32> to vector<16x32xf32>
    %17 = vector.extract_strided_slice %0 {offsets = [0, 122], sizes = [16, 1], strides = [1, 1]} : vector<32x128xf32> to vector<16x1xf32>
    %cst_7 = arith.constant dense<0.000000e+00> : vector<32x4xf32>
    %18 = tpu.matmul %12, %11, %cst_7 {dimension_numbers = #tpu.dot_dimension_numbers<[1], [0], [0], [1], [0, 0, 1, 1], [], []>} : vector<32x8xf32>, vector<8x4xf32>, vector<32x4xf32> -> vector<32x4xf32>
    %19 = vector.broadcast %13 : vector<32x1xf32> to vector<32x4xf32>
    %20 = arith.addf %18, %19 : vector<32x4xf32>
    %cst_8 = arith.constant 0.000000e+00 : f32
    %21 = vector.broadcast %cst_8 : f32 to vector<32x4xf32>
    %22 = arith.maximumf %20, %21 : vector<32x4xf32>
    %cst_9 = arith.constant dense<0.000000e+00> : vector<32x4xf32>
    %23 = tpu.matmul %14, %22, %cst_9 {dimension_numbers = #tpu.dot_dimension_numbers<[1], [0], [0], [1], [0, 0, 1, 1], [], []>} : vector<32x32xf32>, vector<32x4xf32>, vector<32x4xf32> -> vector<32x4xf32>
    %24 = vector.broadcast %15 : vector<32x1xf32> to vector<32x4xf32>
    %25 = arith.addf %23, %24 : vector<32x4xf32>
    %cst_10 = arith.constant 0.000000e+00 : f32
    %26 = vector.broadcast %cst_10 : f32 to vector<32x4xf32>
    %27 = arith.maximumf %25, %26 : vector<32x4xf32>
    %cst_11 = arith.constant dense<0.000000e+00> : vector<16x4xf32>
    %28 = tpu.matmul %16, %27, %cst_11 {dimension_numbers = #tpu.dot_dimension_numbers<[1], [0], [0], [1], [0, 0, 1, 1], [], []>} : vector<16x32xf32>, vector<32x4xf32>, vector<16x4xf32> -> vector<16x4xf32>
    %29 = vector.broadcast %17 : vector<16x1xf32> to vector<16x4xf32>
    %30 = arith.addf %28, %29 : vector<16x4xf32>
    %c0_12 = arith.constant 0 : index
    %c0_13 = arith.constant 0 : index
    %31 = vector.load %arg3[%c0_12, %c0_13] : memref<16x4xf32, #tpu.memory_space<vmem>>, vector<16x4xf32>
    tpu.vector_store %arg3[%c0_12, %c0_13], %30 {strides = array<i32>} : memref<16x4xf32, #tpu.memory_space<vmem>>, vector<16x4xf32>,
    return
  }
}

</mosaic_0001>

<bundles_post_ra>
// kernel: simclr_forward.1
= control target key start
LH: loop header
LB: loop body
LE: loop exit
PB: predicated region body
PF: predicated region fallthrough
CT: control target
= control target key end

     0   :  { %s908_s30 = smov 56   ;;  %v909_v58 = vmov 123   ;;  %vm172_vm0 = vcmask 392192   ;;  %s910_s5 = smov 64   ;;  %vm603_vm1 = vcmask 64512   ;;  %vm661_vm2 = vcmask 261120   ;;  %s1540_s2 = inlined_call_operand.vmem [shape: f32[32,128], index: 2, kind: input, shape index: {}]   ;;  %s1541_s0 = inlined_call_operand.vmem [shape: bf16[48,1024], index: 0, kind: input, shape index: {}]   ;;  %s1542_s1 = inlined_call_operand.vmem [shape: f32[1024,4], index: 1, kind: input, shape index: {}]   ;;  %s1543_s3 = inlined_call_operand.vmem [shape: f32[16,4], index: 3, kind: output, shape index: {}]  }
   0x1   :  { %v938_v0 = vld [vmem:[%s1540_s2] sm:$0xff]  ;;  %v823_v7 = vld [vmem:[%s1541_s0 + $0x88] sm:$0xf]  ;;  %v831_v10 = vld [vmem:[%s1541_s0 + $0x90] sm:$0xf]  ;;  %898 = vset.pattern.permute.xlu0 %v909_v58  ;;  %vm742_vm3 = vcmask 31744  }
   0x2   :  { %v815_v1 = vld [vmem:[%s1541_s0 + $0x80] sm:$0xf]  ;;  %v19_v3 = vpack.c.bf16 %v938_v0, %v938_v0  ;;  %v879_v5 = vld [vmem:[%s1541_s0 + $0x84] sm:$0xf]  ;;  %v884_v9 = vld [vmem:[%s1541_s0 + $0xa4] sm:$0xf0]  ;;  %595 = vrot.lane.b32.xlu1 %v938_v0, %s910_s5 }
   0x3   :  { %v883_v2 = vld [vmem:[%s1541_s0 + $0x9c] sm:$0xf0]  ;;  %v817_v6 = vld [vmem:[%s1541_s0 + $0xa0] sm:$0xf0]  ;;  %v885_v11 = vld [vmem:[%s1541_s0 + $0xac] sm:$0xf0]  ;;  %v824_v12 = vor.u32 %v884_v9, %v823_v7 }
   0x4   :  { %v816_v4 = vor.u32 %v883_v2, %v815_v1  ;;  %v820_v8 = vor.u32 %v879_v5, %v817_v6  ;;  %50 = vrot.lane.b32.xlu0 %v19_v3, %s908_s30  ;;  %v832_v13 = vor.u32 %v885_v11, %v831_v10  ;;  %v783_v14 = vld [vmem:[%s1541_s0 + $0x40] sm:$0xf]  ;;  %v871_v16 = vld [vmem:[%s1541_s0 + $0x44] sm:$0xf]  ;;  %v791_v19 = vld [vmem:[%s1541_s0 + $0x48] sm:$0xf] }
   0x5   :  { %v875_v15 = vld [vmem:[%s1541_s0 + $0x5c] sm:$0xf0]  ;;  %v785_v18 = vld [vmem:[%s1541_s0 + $0x60] sm:$0xf0]  ;;  %v876_v20 = vld [vmem:[%s1541_s0 + $0x64] sm:$0xf0]  ;;  %207 = vmatpush.bf16.msra.mxu2 %v824_v12 }
   0x6   :  { %181 = vmatpush.bf16.msra.mxu3 %v816_v4  ;;  %194 = vmatpush.bf16.msra.mxu1 %v820_v8  ;;  %v784_v17 = vor.u32 %v875_v15, %v783_v14  ;;  %v788_v21 = vor.u32 %v871_v16, %v785_v18  ;;  %v792_v22 = vor.u32 %v876_v20, %v791_v19  ;;  %v799_v23 = vld [vmem:[%s1541_s0 + $0x50] sm:$0xf]  ;;  %v751_v25 = vld [vmem:[%s1541_s0] sm:$0xf]  ;;  %v863_v28 = vld [vmem:[%s1541_s0 + $0x4] sm:$0xf] }
   0x7   :  { %233 = vmatpush.bf16.msra.mxu0 %v832_v13  ;;  %v877_v24 = vld [vmem:[%s1541_s0 + $0x6c] sm:$0xf0]  ;;  %v867_v27 = vld [vmem:[%s1541_s0 + $0x1c] sm:$0xf0]  ;;  %v753_v29 = vld [vmem:[%s1541_s0 + $0x20] sm:$0xf0] }
   0x8   :  { %v800_v26 = vor.u32 %v877_v24, %v799_v23  ;;  %v752_v30 = vor.u32 %v867_v27, %v751_v25  ;;  %v759_v31 = vld [vmem:[%s1541_s0 + $0x8] sm:$0xf]  ;;  %v767_v33 = vld [vmem:[%s1541_s0 + $0x10] sm:$0xf]  ;;  %v756_v34 = vor.u32 %v863_v28, %v753_v29  ;;  %v880_v38 = vld [vmem:[%s1541_s0 + $0x8c] sm:$0xf] }
   0x9   :  { %v868_v32 = vld [vmem:[%s1541_s0 + $0x24] sm:$0xf0]  ;;  %v869_v35 = vld [vmem:[%s1541_s0 + $0x2c] sm:$0xf0]  ;;  %208 = vmatpush.bf16.msra.mxu2 %v792_v22  ;;  %v825_v39 = vld [vmem:[%s1541_s0 + $0xa8] sm:$0xf0] }
   0xa   :  { %182 = vmatpush.bf16.msra.mxu3 %v784_v17  ;;  %195 = vmatpush.bf16.msra.mxu1 %v788_v21  ;;  %v760_v36 = vor.u32 %v868_v32, %v759_v31  ;;  %v768_v37 = vor.u32 %v869_v35, %v767_v33  ;;  %v881_v40 = vld [vmem:[%s1541_s0 + $0x94] sm:$0xf]  ;;  %v828_v41 = vor.u32 %v880_v38, %v825_v39  ;;  %v839_v43 = vld [vmem:[%s1541_s0 + $0x98] sm:$0xf]  ;;  %v872_v47 = vld [vmem:[%s1541_s0 + $0x4c] sm:$0xf] }
   0xb   :  { %234 = vmatpush.bf16.msra.mxu0 %v800_v26  ;;  %v833_v42 = vld [vmem:[%s1541_s0 + $0xb0] sm:$0xf0]  ;;  %v886_v44 = vld [vmem:[%s1541_s0 + $0xb4] sm:$0xf0]  ;;  %v793_v48 = vld [vmem:[%s1541_s0 + $0x68] sm:$0xf0] }
   0xc   :  { %v836_v45 = vor.u32 %v881_v40, %v833_v42  ;;  %v840_v46 = vor.u32 %v886_v44, %v839_v43  ;;  %v873_v49 = vld [vmem:[%s1541_s0 + $0x54] sm:$0xf]  ;;  %v796_v50 = vor.u32 %v872_v47, %v793_v48  ;;  %v807_v52 = vld [vmem:[%s1541_s0 + $0x58] sm:$0xf]  ;;  %v864_v56 = vld [vmem:[%s1541_s0 + $0xc] sm:$0xf]  ;;  %46 = vperm.xlu0 %898, %v938_v0  }
   0xd   :  { %209 = vmatpush.bf16.msra.mxu2 %v760_v36  ;;  %v801_v51 = vld [vmem:[%s1541_s0 + $0x70] sm:$0xf0]  ;;  %v878_v53 = vld [vmem:[%s1541_s0 + $0x74] sm:$0xf0]  ;;  %v761_v57 = vld [vmem:[%s1541_s0 + $0x28] sm:$0xf0] }
   0xe   :  { %183 = vmatpush.bf16.msra.mxu3 %v752_v30  ;;  %196 = vmatpush.bf16.msra.mxu1 %v756_v34  ;;  %v804_v54 = vor.u32 %v873_v49, %v801_v51  ;;  %v808_v55 = vor.u32 %v878_v53, %v807_v52  ;;  %v865_v59 = vld [vmem:[%s1541_s0 + $0x14] sm:$0xf]  ;;  %v775_v61 = vld [vmem:[%s1541_s0 + $0x18] sm:$0xf]  ;;  %v764_v63 = vor.u32 %v864_v56, %v761_v57  ;;  %v882_v3 = vld [vmem:[%s1541_s0 + $0x9c] sm:$0xf] }
   0xf   :  { %235 = vmatpush.bf16.msra.mxu0 %v768_v37  ;;  %v769_v60 = vld [vmem:[%s1541_s0 + $0x30] sm:$0xf0]  ;;  %v870_v62 = vld [vmem:[%s1541_s0 + $0x34] sm:$0xf0]  ;;  %v841_v4 = vld [vmem:[%s1541_s0 + $0xb8] sm:$0xf0] }
  0x10   :  { %v772_v1 = vor.u32 %v865_v59, %v769_v60  ;;  %v776_v2 = vor.u32 %v870_v62, %v775_v61  ;;  %v844_v5 = vor.u32 %v882_v3, %v841_v4  ;;  %v874_v7 = vld [vmem:[%s1541_s0 + $0x5c] sm:$0xf]  ;;  %v302_v11 = vld [vmem:[%s1542_s1 + $0x70] sm:$0xff]  ;;  %v301_v16 = vld [vmem:[%s1542_s1 + $0x68] sm:$0xff] }
  0x11   :  { %259 = vmatpush.bf16.msrb.mxu2 %v840_v46  ;;  %v809_v8 = vld [vmem:[%s1541_s0 + $0x78] sm:$0xf0]  ;;  %v318_v14 = vld [vmem:[%s1542_s1 + $0xf0] sm:$0xff]  ;;  %v317_v18 = vld [vmem:[%s1542_s1 + $0xe8] sm:$0xff] }
  0x12   :  { %220 = vmatpush.bf16.msrb.mxu3 %v828_v41  ;;  %246 = vmatpush.bf16.msrb.mxu1 %v836_v45  ;;  %v303_v9 = vld [vmem:[%s1542_s1 + $0x78] sm:$0xff]  ;;  %v812_v12 = vor.u32 %v874_v7, %v809_v8  ;;  %v334_v19 = vld [vmem:[%s1542_s1 + $0x170] sm:$0xff]  ;;  %v300_v20 = vld [vmem:[%s1542_s1 + $0x60] sm:$0xff] }
  0x13   :  { %v319_v10 = vld [vmem:[%s1542_s1 + $0xf8] sm:$0xff]  ;;  %416 = vmatpush.msrb.mxu0 %v303_v9  ;;  %v316_v22 = vld [vmem:[%s1542_s1 + $0xe0] sm:$0xff]  ;;  %v333_v23 = vld [vmem:[%s1542_s1 + $0x168] sm:$0xff] }
  0x14   :  { %v866_v13 = vld [vmem:[%s1541_s0 + $0x1c] sm:$0xf]  ;;  %v332_v26 = vld [vmem:[%s1542_s1 + $0x160] sm:$0xff]  ;;  %v298_v27 = vld [vmem:[%s1542_s1 + $0x50] sm:$0xff] }
  0x15   :  { %260 = vmatpush.bf16.msrb.mxu2 %v808_v55  ;;  %v777_v15 = vld [vmem:[%s1541_s0 + $0x38] sm:$0xf0]  ;;  %417 = vmatpush.msrb.mxu0 %v302_v11  ;;  %v314_v28 = vld [vmem:[%s1542_s1 + $0xd0] sm:$0xff]  ;;  %v297_v30 = vld [vmem:[%s1542_s1 + $0x48] sm:$0xff] }
  0x16   :  { %221 = vmatpush.bf16.msrb.mxu3 %v796_v50  ;;  %247 = vmatpush.bf16.msrb.mxu1 %v804_v54  ;;  %v335_v17 = vld [vmem:[%s1542_s1 + $0x178] sm:$0xff]  ;;  %v780_v21 = vor.u32 %v866_v13, %v777_v15  ;;  %v313_v31 = vld [vmem:[%s1542_s1 + $0xc8] sm:$0xff]  ;;  %v330_v32 = vld [vmem:[%s1542_s1 + $0x150] sm:$0xff] }
  0x17   :  { %418 = vmatpush.msrb.mxu0 %v301_v16  ;;  %v299_v24 = vld [vmem:[%s1542_s1 + $0x58] sm:$0xff]  ;;  %v296_v33 = vld [vmem:[%s1542_s1 + $0x40] sm:$0xff]  ;;  %v329_v35 = vld [vmem:[%s1542_s1 + $0x148] sm:$0xff] }
  0x18   :  { %v315_v25 = vld [vmem:[%s1542_s1 + $0xd8] sm:$0xff]  ;;  %v312_v34 = vld [vmem:[%s1542_s1 + $0xc0] sm:$0xff]  ;;  %v294_v40 = vld [vmem:[%s1542_s1 + $0x30] sm:$0xff] }
  0x19   :  { %261 = vmatpush.bf16.msrb.mxu2 %v776_v2  ;;  %419 = vmatpush.msrb.mxu0 %v300_v20  ;;  %v331_v29 = vld [vmem:[%s1542_s1 + $0x158] sm:$0xff]  ;;  %v328_v39 = vld [vmem:[%s1542_s1 + $0x140] sm:$0xff]  ;;  %v350_v41 = vld [vmem:[%s1542_s1 + $0x1f0] sm:$0xff] }
  0x1a   :  { %222 = vmatpush.bf16.msrb.mxu3 %v764_v63  ;;  %248 = vmatpush.bf16.msrb.mxu1 %v772_v1  ;;  %v295_v36 = vld [vmem:[%s1542_s1 + $0x38] sm:$0xff]  ;;  %v310_v42 = vld [vmem:[%s1542_s1 + $0xb0] sm:$0xff]  ;;  %v293_v44 = vld [vmem:[%s1542_s1 + $0x28] sm:$0xff] }
  0x1b   :  { %420 = vmatpush.msrb.mxu0 %v299_v24  ;;  %v351_v37 = vld [vmem:[%s1542_s1 + $0x1f8] sm:$0xff]  ;;  %v349_v45 = vld [vmem:[%s1542_s1 + $0x1e8] sm:$0xff]  ;;  %v326_v47 = vld [vmem:[%s1542_s1 + $0x130] sm:$0xff] }
  0x1c   :  { %v311_v38 = vld [vmem:[%s1542_s1 + $0xb8] sm:$0xff]  ;;  %v309_v46 = vld [vmem:[%s1542_s1 + $0xa8] sm:$0xff]  ;;  %v292_v48 = vld [vmem:[%s1542_s1 + $0x20] sm:$0xff] }
  0x1d   :  { %421 = vmatpush.msrb.mxu0 %v298_v27  ;;  %v327_v43 = vld [vmem:[%s1542_s1 + $0x138] sm:$0xff]  ;;  %v348_v49 = vld [vmem:[%s1542_s1 + $0x1e0] sm:$0xff]  ;;  %v325_v51 = vld [vmem:[%s1542_s1 + $0x128] sm:$0xff] }
  0x1e   :  { %v308_v50 = vld [vmem:[%s1542_s1 + $0xa0] sm:$0xff]  ;;  %v291_v52 = vld [vmem:[%s1542_s1 + $0x18] sm:$0xff]  ;;  %v290_v56 = vld [vmem:[%s1542_s1 + $0x10] sm:$0xff] }
  0x1f   :  { %422 = vmatpush.msrb.mxu0 %v297_v30  ;;  %v347_v53 = vld [vmem:[%s1542_s1 + $0x1d8] sm:$0xff]  ;;  %v324_v55 = vld [vmem:[%s1542_s1 + $0x120] sm:$0xff]  ;;  %v346_v57 = vld [vmem:[%s1542_s1 + $0x1d0] sm:$0xff] }
  0x20   :  { %v307_v54 = vld [vmem:[%s1542_s1 + $0x98] sm:$0xff]  ;;  %v306_v58 = vld [vmem:[%s1542_s1 + $0x90] sm:$0xff]  ;;  %v289_v60 = vld [vmem:[%s1542_s1 + $0x8] sm:$0xff] }
  0x21   :  { %423 = vmatpush.msrb.mxu0 %v296_v33  ;;  %v323_v59 = vld [vmem:[%s1542_s1 + $0x118] sm:$0xff]  ;;  %v345_v61 = vld [vmem:[%s1542_s1 + $0x1c8] sm:$0xff]  ;;  %v288_v63 = vld [vmem:[%s1542_s1] sm:$0xff] }
  0x22   :  { %v305_v62 = vld [vmem:[%s1542_s1 + $0x88] sm:$0xff]  ;;  %v322_v1 = vld [vmem:[%s1542_s1 + $0x110] sm:$0xff]  ;;  %v367_v2 = vld [vmem:[%s1542_s1 + $0x278] sm:$0xff] }
  0x23   :  { %424 = vmatpush.msrb.mxu0 %v295_v36  ;;  %v304_v3 = vld [vmem:[%s1542_s1 + $0x80] sm:$0xff]  ;;  %v383_v4 = vld [vmem:[%s1542_s1 + $0x2f8] sm:$0xff]  ;;  %v366_v7 = vld [vmem:[%s1542_s1 + $0x270] sm:$0xff] }
  0x24   :  { %v344_v8 = vld [vmem:[%s1542_s1 + $0x1c0] sm:$0xff]  ;;  %v399_v11 = vld [vmem:[%s1542_s1 + $0x378] sm:$0xff]  ;;  %v398_v15 = vld [vmem:[%s1542_s1 + $0x370] sm:$0xff] }
  0x25   :  { %425 = vmatpush.msrb.mxu0 %v294_v40  ;;  %v320_v9 = vld [vmem:[%s1542_s1 + $0x100] sm:$0xff]  ;;  %v343_v13 = vld [vmem:[%s1542_s1 + $0x1b8] sm:$0xff]  ;;  %v362_v20 = vld [vmem:[%s1542_s1 + $0x250] sm:$0xff] }
  0x26   :  { %v380_v16 = vld [vmem:[%s1542_s1 + $0x2e0] sm:$0xff]  ;;  %v341_v24 = vld [vmem:[%s1542_s1 + $0x1a8] sm:$0xff]  ;;  %v358_v33 = vld [vmem:[%s1542_s1 + $0x230] sm:$0xff] }
  0x27   :  { %426 = vmatpush.msrb.mxu0 %v293_v44  ;;  %v396_v27 = vld [vmem:[%s1542_s1 + $0x360] sm:$0xff]  ;;  %v338_v36 = vld [vmem:[%s1542_s1 + $0x190] sm:$0xff]  ;;  %v337_v40 = vld [vmem:[%s1542_s1 + $0x188] sm:$0xff] }
  0x28   :  { %v376_v30 = vld [vmem:[%s1542_s1 + $0x2c0] sm:$0xff] }
  0x29   :  { %427 = vmatpush.msrb.mxu0 %v292_v48  ;;  %v336_v44 = vld [vmem:[%s1542_s1 + $0x180] sm:$0xff]  ;;  %v415_v48 = vld [vmem:[%s1542_s1 + $0x3f8] sm:$0xff] }
  0x2b   :  { %428 = vmatpush.msrb.mxu0 %v291_v52  ;;  %v414_v52 = vld [vmem:[%s1542_s1 + $0x3f0] sm:$0xff] }
  0x2d   :  { %429 = vmatpush.msrb.mxu0 %v290_v56  ;;  %v413_v56 = vld [vmem:[%s1542_s1 + $0x3e8] sm:$0xff] }
  0x2f   :  { %430 = vmatpush.msrb.mxu0 %v289_v60  ;;  %v412_v60 = vld [vmem:[%s1542_s1 + $0x3e0] sm:$0xff] }
  0x31   :  { %431 = vmatpush.msrb.mxu0 %v288_v63  ;;  %v411_v63 = vld [vmem:[%s1542_s1 + $0x3d8] sm:$0xff] }
  0x76   :  { %v1075_v6 = vpop.permute.xlu0 %50 }
  0x77   :  { %845 = vmatmul.msk.bf16.vlgmr.msra.gmra.mxu3 %vm172_vm0, %v1075_v6  ;;  %846 = vmatmul.msk.bf16.vlgmr.msra.gmra.mxu1 %vm172_vm0, %v1075_v6 }
  0x78   :  { %847 = vmatmul.msk.bf16.vlgmr.msra.gmra.mxu2 %vm172_vm0, %v1075_v6  ;;  %849 = vmatmul.msk.bf16.vlgmr.msra.gmra.mxu0 %vm172_vm0, %v1075_v6 }
  0x79   :  { %272 = vmatpush.bf16.msra.mxu3 %v844_v5  ;;  %436 = vmatpush.msra.mxu1 %v319_v10  ;;  %v321_v5 = vld [vmem:[%s1542_s1 + $0x108] sm:$0xff] }
  0x7a   :  { %456 = vmatpush.msra.mxu2 %v335_v17  ;;  %496 = vmatpush.msra.mxu0 %v367_v2  ;;  %v365_v10 = vld [vmem:[%s1542_s1 + $0x268] sm:$0xff]  ;;  %v342_v17 = vld [vmem:[%s1542_s1 + $0x1b0] sm:$0xff] }
  0x7b   :  { %437 = vmatpush.msra.mxu1 %v318_v14  ;;  %v364_v14 = vld [vmem:[%s1542_s1 + $0x260] sm:$0xff]  ;;  %v410_v2 = vld [vmem:[%s1542_s1 + $0x3d0] sm:$0xff] }
  0x7c   :  { %457 = vmatpush.msra.mxu2 %v334_v19  ;;  %497 = vmatpush.msra.mxu0 %v366_v7  ;;  %v379_v19 = vld [vmem:[%s1542_s1 + $0x2d8] sm:$0xff]  ;;  %v408_v7 = vld [vmem:[%s1542_s1 + $0x3c0] sm:$0xff] }
  0x7d   :  { %273 = vmatpush.bf16.msra.mxu3 %v812_v12  ;;  %438 = vmatpush.msra.mxu1 %v317_v18  ;;  %v381_v12 = vld [vmem:[%s1542_s1 + $0x2e8] sm:$0xff]  ;;  %v363_v18 = vld [vmem:[%s1542_s1 + $0x258] sm:$0xff] }
  0x7e   :  { %458 = vmatpush.msra.mxu2 %v333_v23  ;;  %498 = vmatpush.msra.mxu0 %v365_v10  ;;  %v397_v23 = vld [vmem:[%s1542_s1 + $0x368] sm:$0xff] }
  0x7f   :  { %439 = vmatpush.msra.mxu1 %v316_v22  ;;  %v378_v22 = vld [vmem:[%s1542_s1 + $0x2d0] sm:$0xff]  ;;  %v405_v10 = vld [vmem:[%s1542_s1 + $0x3a8] sm:$0xff] }
  0x80   :  { %459 = vmatpush.msra.mxu2 %v332_v26  ;;  %499 = vmatpush.msra.mxu0 %v364_v14  ;;  %v377_v26 = vld [vmem:[%s1542_s1 + $0x2c8] sm:$0xff]  ;;  %v404_v14 = vld [vmem:[%s1542_s1 + $0x3a0] sm:$0xff] }
  0x81   :  { %274 = vmatpush.bf16.msra.mxu3 %v780_v21  ;;  %440 = vmatpush.msra.mxu1 %v315_v25  ;;  %v361_v21 = vld [vmem:[%s1542_s1 + $0x248] sm:$0xff]  ;;  %v360_v25 = vld [vmem:[%s1542_s1 + $0x240] sm:$0xff] }
  0x82   :  { %460 = vmatpush.msra.mxu2 %v331_v29  ;;  %500 = vmatpush.msra.mxu0 %v363_v18  ;;  %v359_v29 = vld [vmem:[%s1542_s1 + $0x238] sm:$0xff]  ;;  %v402_v18 = vld [vmem:[%s1542_s1 + $0x390] sm:$0xff] }
  0x83   :  { %441 = vmatpush.msra.mxu1 %v314_v28  ;;  %v340_v28 = vld [vmem:[%s1542_s1 + $0x1a0] sm:$0xff] }
  0x84   :  { %461 = vmatpush.msra.mxu2 %v330_v32  ;;  %501 = vmatpush.msra.mxu0 %v362_v20  ;;  %v339_v32 = vld [vmem:[%s1542_s1 + $0x198] sm:$0xff] }
  0x85   :  { %442 = vmatpush.msra.mxu1 %v313_v31  ;;  %v395_v31 = vld [vmem:[%s1542_s1 + $0x358] sm:$0xff] }
  0x86   :  { %462 = vmatpush.msra.mxu2 %v329_v35  ;;  %502 = vmatpush.msra.mxu0 %v361_v21  ;;  %v394_v35 = vld [vmem:[%s1542_s1 + $0x350] sm:$0xff] }
  0x87   :  { %848 = vmatmul.msk.bf16.vlgmr.msrb.gmra.mxu3 %vm172_vm0, %v1075_v6  ;;  %850 = vmatmul.msk.bf16.vlgmr.msrb.gmra.mxu1 %vm172_vm0, %v1075_v6 }
  0x88   :  { %851 = vmatmul.msk.bf16.vlgmr.msrb.gmra.mxu2 %vm172_vm0, %v1075_v6  ;;  %443 = vmatpush.msra.mxu1 %v312_v34  ;;  %v375_v34 = vld [vmem:[%s1542_s1 + $0x2b8] sm:$0xff] }
  0x89   :  { %476 = vmatpush.msrb.mxu3 %v351_v37  ;;  %463 = vmatpush.msra.mxu2 %v328_v39  ;;  %v357_v37 = vld [vmem:[%s1542_s1 + $0x228] sm:$0xff] }
  0x8a   :  { %444 = vmatpush.msra.mxu1 %v311_v38  ;;  %503 = vmatpush.msra.mxu0 %v360_v25  ;;  %v374_v38 = vld [vmem:[%s1542_s1 + $0x2b0] sm:$0xff]  ;;  %v393_v39 = vld [vmem:[%s1542_s1 + $0x348] sm:$0xff] }
  0x8b   :  { %477 = vmatpush.msrb.mxu3 %v350_v41  ;;  %464 = vmatpush.msra.mxu2 %v327_v43  ;;  %v356_v41 = vld [vmem:[%s1542_s1 + $0x220] sm:$0xff] }
  0x8c   :  { %445 = vmatpush.msra.mxu1 %v310_v42  ;;  %504 = vmatpush.msra.mxu0 %v359_v29  ;;  %v373_v42 = vld [vmem:[%s1542_s1 + $0x2a8] sm:$0xff]  ;;  %v392_v43 = vld [vmem:[%s1542_s1 + $0x340] sm:$0xff] }
  0x8d   :  { %478 = vmatpush.msrb.mxu3 %v349_v45  ;;  %465 = vmatpush.msra.mxu2 %v326_v47  ;;  %v355_v45 = vld [vmem:[%s1542_s1 + $0x218] sm:$0xff] }
  0x8e   :  { %446 = vmatpush.msra.mxu1 %v309_v46  ;;  %505 = vmatpush.msra.mxu0 %v358_v33  ;;  %v372_v46 = vld [vmem:[%s1542_s1 + $0x2a0] sm:$0xff]  ;;  %v391_v47 = vld [vmem:[%s1542_s1 + $0x338] sm:$0xff] }
  0x8f   :  { %479 = vmatpush.msrb.mxu3 %v348_v49  ;;  %466 = vmatpush.msra.mxu2 %v325_v51  ;;  %v354_v49 = vld [vmem:[%s1542_s1 + $0x210] sm:$0xff] }
  0x90   :  { %447 = vmatpush.msra.mxu1 %v308_v50  ;;  %506 = vmatpush.msra.mxu0 %v357_v37  ;;  %v371_v50 = vld [vmem:[%s1542_s1 + $0x298] sm:$0xff]  ;;  %v390_v51 = vld [vmem:[%s1542_s1 + $0x330] sm:$0xff] }
  0x91   :  { %480 = vmatpush.msrb.mxu3 %v347_v53  ;;  %467 = vmatpush.msra.mxu2 %v324_v55  ;;  %v353_v53 = vld [vmem:[%s1542_s1 + $0x208] sm:$0xff]  ;;  %v1508_v37 = vld [vmem:[%s1540_s2 + $0x18] sm:$0xff] }
  0x92   :  { %448 = vmatpush.msra.mxu1 %v307_v54  ;;  %507 = vmatpush.msra.mxu0 %v356_v41  ;;  %v370_v54 = vld [vmem:[%s1542_s1 + $0x290] sm:$0xff]  ;;  %v389_v55 = vld [vmem:[%s1542_s1 + $0x328] sm:$0xff] }
  0x93   :  { %481 = vmatpush.msrb.mxu3 %v346_v57  ;;  %468 = vmatpush.msra.mxu2 %v323_v59  ;;  %v352_v57 = vld [vmem:[%s1542_s1 + $0x200] sm:$0xff] }
  0x94   :  { %449 = vmatpush.msra.mxu1 %v306_v58  ;;  %508 = vmatpush.msra.mxu0 %v355_v45  ;;  %v369_v58 = vld [vmem:[%s1542_s1 + $0x288] sm:$0xff]  ;;  %v388_v59 = vld [vmem:[%s1542_s1 + $0x320] sm:$0xff] }
  0x95   :  { %482 = vmatpush.msrb.mxu3 %v345_v61  ;;  %469 = vmatpush.msra.mxu2 %v322_v1  ;;  %v368_v61 = vld [vmem:[%s1542_s1 + $0x280] sm:$0xff]  ;;  %v386_v1 = vld [vmem:[%s1542_s1 + $0x310] sm:$0xff] }
  0x96   :  { %450 = vmatpush.msra.mxu1 %v305_v62  ;;  %509 = vmatpush.msra.mxu0 %v354_v49  ;;  %v387_v62 = vld [vmem:[%s1542_s1 + $0x318] sm:$0xff] }
  0x97   :  { %852 = vmatmul.msk.bf16.vlgmr.msra.gmra.mxu3 %vm172_vm0, %v1075_v6  ;;  %v382_v6 = vld [vmem:[%s1542_s1 + $0x2f0] sm:$0xff]  ;;  %470 = vmatpush.msra.mxu2 %v321_v5  ;;  %v384_v5 = vld [vmem:[%s1542_s1 + $0x300] sm:$0xff] }
  0x98   :  { %451 = vmatpush.msra.mxu1 %v304_v3  ;;  %483 = vmatpush.msrb.mxu3 %v344_v8  ;;  %v385_v3 = vld [vmem:[%s1542_s1 + $0x308] sm:$0xff]  ;;  %v407_v8 = vld [vmem:[%s1542_s1 + $0x3b8] sm:$0xff] }
  0x99   :  { %471 = vmatpush.msra.mxu2 %v320_v9  ;;  %510 = vmatpush.msra.mxu0 %v353_v53  ;;  %v406_v9 = vld [vmem:[%s1542_s1 + $0x3b0] sm:$0xff] }
  0x9a   :  { %516 = vmatpush.msrb.mxu1 %v383_v4  ;;  %484 = vmatpush.msrb.mxu3 %v343_v13  ;;  %v409_v4 = vld [vmem:[%s1542_s1 + $0x3c8] sm:$0xff] }
  0x9b   :  { %536 = vmatpush.msrb.mxu2 %v399_v11  ;;  %511 = vmatpush.msra.mxu0 %v352_v57 }
  0x9c   :  { %517 = vmatpush.msrb.mxu1 %v382_v6  ;;  %485 = vmatpush.msrb.mxu3 %v342_v17  ;;  %v47_v6 = vpop.permute.xlu0 %46 }
  0x9d   :  { %537 = vmatpush.msrb.mxu2 %v398_v15 }
  0x9e   :  { %518 = vmatpush.msrb.mxu1 %v381_v12  ;;  %486 = vmatpush.msrb.mxu3 %v341_v24 }
  0x9f   :  { %538 = vmatpush.msrb.mxu2 %v397_v23  ;;  %v401_v23 = vld [vmem:[%s1542_s1 + $0x388] sm:$0xff] }
  0xa0   :  { %519 = vmatpush.msrb.mxu1 %v380_v16  ;;  %487 = vmatpush.msrb.mxu3 %v340_v28  ;;  %v403_v16 = vld [vmem:[%s1542_s1 + $0x398] sm:$0xff] }
  0xa1   :  { %539 = vmatpush.msrb.mxu2 %v396_v27 }
  0xa2   :  { %520 = vmatpush.msrb.mxu1 %v379_v19  ;;  %488 = vmatpush.msrb.mxu3 %v339_v32 }
  0xa3   :  { %540 = vmatpush.msrb.mxu2 %v395_v31  ;;  %v1499_v31 = vld [vmem:[%s1540_s2 + $0x10] sm:$0xff] }
  0xa4   :  { %521 = vmatpush.msrb.mxu1 %v378_v22  ;;  %489 = vmatpush.msrb.mxu3 %v338_v36 }
  0xa5   :  { %541 = vmatpush.msrb.mxu2 %v394_v35  ;;  %599 = vrot.lane.b32.xlu2 %v1499_v31, %s910_s5 }
  0xa6   :  { %522 = vmatpush.msrb.mxu1 %v377_v26  ;;  %490 = vmatpush.msrb.mxu3 %v337_v40  ;;  %v400_v26 = vld [vmem:[%s1542_s1 + $0x380] sm:$0xff] }
  0xa7   :  { %542 = vmatpush.msrb.mxu2 %v393_v39 }
  0xa8   :  { %523 = vmatpush.msrb.mxu1 %v376_v30  ;;  %491 = vmatpush.msrb.mxu3 %v336_v44  ;;  %v1494_v30 = vld [vmem:[%s1540_s2 + $0x8] sm:$0xff]  ;;  %s913_s2 = smov 96  }
  0xa9   :  { %543 = vmatpush.msrb.mxu2 %v392_v43  ;;  %597 = vrot.lane.b32.xlu1 %v1494_v30, %s910_s5 }
  0xaa   :  { %524 = vmatpush.msrb.mxu1 %v375_v34  ;;  %556 = vmatpush.msra.mxu3 %v415_v48 }
  0xab   :  { %544 = vmatpush.msrb.mxu2 %v391_v47 }
  0xac   :  { %525 = vmatpush.msrb.mxu1 %v374_v38  ;;  %557 = vmatpush.msra.mxu3 %v414_v52 }
  0xad   :  { %545 = vmatpush.msrb.mxu2 %v390_v51  ;;  %601 = vrot.lane.b32.xlu2 %v1508_v37, %s910_s5  ;;  %v911_v51 = vmov 120  }
  0xae   :  { %526 = vmatpush.msrb.mxu1 %v373_v42  ;;  %558 = vmatpush.msra.mxu3 %v413_v56 }
  0xaf   :  { %546 = vmatpush.msrb.mxu2 %v389_v55  ;;  %899 = vset.pattern.permute.xlu1 %v911_v51 }
  0xb0   :  { %527 = vmatpush.msrb.mxu1 %v372_v46  ;;  %559 = vmatpush.msra.mxu3 %v412_v60 }
  0xb1   :  { %547 = vmatpush.msrb.mxu2 %v388_v59  ;;  %901 = vset.pattern.permute.xlu0 %v911_v51 }
  0xb2   :  { %528 = vmatpush.msrb.mxu1 %v371_v50  ;;  %560 = vmatpush.msra.mxu3 %v411_v63 }
  0xb3   :  { %548 = vmatpush.msrb.mxu2 %v387_v62  ;;  %592 = vperm.xlu1 %899, %v1508_v37  }
  0xb4   :  { %529 = vmatpush.msrb.mxu1 %v370_v54  ;;  %561 = vmatpush.msra.mxu3 %v410_v2  ;;  %v596_v2 = vpop.permute.xlu1 %595 }
  0xb5   :  { %549 = vmatpush.msrb.mxu2 %v386_v1  ;;  %582 = vperm.xlu0 %901, %v1494_v30  }
  0xb6   :  { %530 = vmatpush.msrb.mxu1 %v369_v58  ;;  %562 = vmatpush.msra.mxu3 %v409_v4 }
  0xb7   :  { %550 = vmatpush.msrb.mxu2 %v385_v3  ;;  %900 = vset.pattern.permute.xlu2 %v911_v51 }
  0xb8   :  { %531 = vmatpush.msrb.mxu1 %v368_v61  ;;  %563 = vmatpush.msra.mxu3 %v408_v7 }
  0xb9   :  { %551 = vmatpush.msrb.mxu2 %v384_v5  ;;  %587 = vperm.xlu2 %900, %v1499_v31  }
  0xba   :  { %564 = vmatpush.msra.mxu3 %v407_v8 }
  0xbb   :  { %577 = vperm.xlu1 %899, %v938_v0  }
  0xbc   :  { %565 = vmatpush.msra.mxu3 %v406_v9 }
  0xbe   :  { %566 = vmatpush.msra.mxu3 %v405_v10 }
  0xc0   :  { %567 = vmatpush.msra.mxu3 %v404_v14 }
  0xc2   :  { %568 = vmatpush.msra.mxu3 %v403_v16 }
  0xc4   :  { %569 = vmatpush.msra.mxu3 %v402_v18 }
  0xc6   :  { %570 = vmatpush.msra.mxu3 %v401_v23 }
  0xc8   :  { %571 = vmatpush.msra.mxu3 %v400_v26 }
  0xf4   :  { %v198_v11 = vpop.f32.mrf.mxu1 }
  0xf5   :  { %v199_v12 = vadd.f32 %v198_v11, %v47_v6  ;;  %v237_v13 = vpop.f32.mrf.mxu0 }
  0xf6   :  { %v238_v28 = vadd.f32 %v237_v13, %v47_v6 }
  0xf7   :  { %v281_v15 = vmax.f32 %v199_v12, 0.0  ;;  %v912_v12 = vmov 121  }
  0xf8   :  { %v284_v34 = vmax.f32 %v238_v28, 0.0  ;;  %903 = vset.pattern.permute.xlu1 %v912_v12  ;;  %902 = vset.pattern.permute.xlu2 %v912_v12 }
  0xf9   :  { %452 = vmatmul.f32.vlgmr.msra.gmra.mxu1 %v281_v15  ;;  %654 = vperm.xlu1 %903, %v1499_v31  }
  0xfa   :  { %v185_v17 = vpop.f32.mrf.mxu3  ;;  %658 = vperm.xlu2 %902, %v1508_v37   ;;  %904 = vset.pattern.permute.xlu0 %v912_v12 }
  0xfb   :  { %v186_v19 = vadd.f32 %v185_v17, %v47_v6  ;;  %v211_v20 = vpop.f32.mrf.mxu2  ;;  %646 = vperm.xlu0 %904, %v938_v0  }
  0xfc   :  { %v212_v21 = vadd.f32 %v211_v20, %v47_v6  ;;  %v200_v22 = vpop.f32.mrf.mxu1 }
  0xfd   :  { %v280_v24 = vmax.f32 %v186_v19, 0.0  ;;  %v239_v25 = vpop.f32.mrf.mxu0 }
  0xfe   :  { %v282_v27 = vmax.f32 %v212_v21, 0.0 }
  0xff   :  { %432 = vmatmul.f32.vlgmr.msrb.gmra.mxu0 %v280_v24  ;;  %v600_v7 = vpop.permute.xlu2 %599 }
 0x100   :  { %472 = vmatmul.f32.vlgmr.msra.gmra.mxu2 %v282_v27  ;;  %v914_v27 = vmov 122  }
 0x101   :  { %711 = vrot.lane.b32.xlu1 %v938_v0, %s913_s2 }
 0x102   :  { %v187_v29 = vpop.f32.mrf.mxu3  ;;  %650 = vperm.xlu2 %902, %v1494_v30   ;;  %905 = vset.pattern.permute.xlu1 %v914_v27 }
 0x103   :  { %v213_v32 = vpop.f32.mrf.mxu2  ;;  %907 = vset.pattern.permute.xlu0 %v914_v27 }
 0x104   :  { %v250_v33 = vpop.f32.mrf.mxu1 }
 0x105   :  { %v251_v35 = vadd.f32 %v250_v33, %v47_v6 }
 0x107   :  { %v285_v36 = vmax.f32 %v251_v35, 0.0  ;;  %512 = vmatmul.f32.vlgmr.msra.gmra.mxu0 %v284_v34  ;;  %v602_v8 = vpop.permute.xlu2 %601 }
 0x109   :  { %532 = vmatmul.f32.vlgmr.msrb.gmra.mxu1 %v285_v36  ;;  %704 = vperm.xlu1 %905, %v938_v0  }
 0x10a   :  { %v224_v38 = vpop.f32.mrf.mxu3  ;;  %713 = vrot.lane.b32.xlu2 %v1494_v30, %s913_s2 }
 0x10b   :  { %v225_v39 = vadd.f32 %v224_v38, %v47_v6  ;;  %v263_v40 = vpop.f32.mrf.mxu2  ;;  %906 = vset.pattern.permute.xlu2 %v914_v27 }
 0x10c   :  { %v264_v41 = vadd.f32 %v263_v40, %v47_v6  ;;  %v252_v42 = vpop.f32.mrf.mxu1 }
 0x10d   :  { %v283_v43 = vmax.f32 %v225_v39, 0.0 }
 0x10e   :  { %v286_v44 = vmax.f32 %v264_v41, 0.0 }
 0x10f   :  { %492 = vmatmul.f32.vlgmr.msrb.gmra.mxu3 %v283_v43 }
 0x110   :  { %552 = vmatmul.f32.vlgmr.msrb.gmra.mxu2 %v286_v44 }
 0x112   :  { %v226_v45 = vpop.f32.mrf.mxu3  ;;  %708 = vperm.xlu2 %906, %v1494_v30  }
 0x113   :  { %v265_v46 = vpop.f32.mrf.mxu2  ;;  %v588_v13 = vpop.permute.xlu2 %587 }
 0x11a   :  { %v276_v47 = vpop.f32.mrf.mxu3 }
 0x11b   :  { %v277_v48 = vadd.f32 %v276_v47, %v47_v6  ;;  %v598_v5 = vpop.permute.xlu1 %597 }
 0x11d   :  { %v287_v49 = vmax.f32 %v277_v48, 0.0 }
 0x11f   :  { %572 = vmatmul.f32.vlgmr.msra.gmra.mxu3 %v287_v49 }
 0x122   :  { %v278_v50 = vpop.f32.mrf.mxu3 }
 0x125   :  { %v593_v10 = vpop.permute.xlu1 %592 }
 0x127   :  { %v583_v14 = vpop.permute.xlu0 %582 }
 0x12d   :  { %v578_v18 = vpop.permute.xlu1 %577 }
 0x154   :  { %v659_v26 = vpop.permute.xlu2 %658 }
 0x15c   :  { %v651_v32 = vpop.permute.xlu2 %650 }
 0x16b   :  { %v655_v29 = vpop.permute.xlu1 %654 }
 0x16d   :  { %v647_v33 = vpop.permute.xlu0 %646 }
 0x176   :  { %v453_v53 = vpop.f32.mrf.mxu1 }
 0x17c   :  { %v433_v52 = vpop.f32.mrf.mxu0 }
 0x17d   :  { %v454_v55 = vadd.f32 %v453_v53, %v433_v52 }
 0x183   :  { %v473_v54 = vpop.f32.mrf.mxu2 }
 0x184   :  { %v474_v57 = vadd.f32 %v473_v54, %v454_v55  ;;  %v513_v59 = vpop.f32.mrf.mxu0 }
 0x186   :  { %v533_v61 = vpop.f32.mrf.mxu1 }
 0x192   :  { %v493_v56 = vpop.f32.mrf.mxu3 }
 0x193   :  { %v494_v58 = vadd.f32 %v493_v56, %v474_v57  ;;  %v553_v63 = vpop.f32.mrf.mxu2 }
 0x195   :  { %v514_v60 = vadd.f32 %v513_v59, %v494_v58 }
 0x197   :  { %v534_v62 = vadd.f32 %v533_v61, %v514_v60 }
 0x199   :  { %v554_v1 = vadd.f32 %v553_v63, %v534_v62 }
 0x1a2   :  { %v573_v3 = vpop.f32.mrf.mxu3 }
 0x1a3   :  { %v574_v4 = vadd.f32 %v573_v3, %v554_v1 }
 0x1a5   :  { %627 = vmatpush.msrb.mxu0 %v574_v4 }
 0x1a6   :  { %853 = vmatmul.msk.f32.vlgmr.msrb.gmra.mxu0 %vm603_vm1, %v596_v2 }
 0x1ae   :  { %854 = vmatmul.msk.f32.gmra.mxu0 %vm603_vm1, %v598_v5 }
 0x1b6   :  { %855 = vmatmul.msk.f32.gmra.mxu0 %vm603_vm1, %v600_v7 }
 0x1be   :  { %856 = vmatmul.msk.f32.gmra.mxu0 %vm603_vm1, %v602_v8 }
 0x223   :  { %v629_v6 = vpop.f32.mrf.mxu0 }
 0x224   :  { %v630_v21 = vadd.f32 %v629_v6, %v578_v18 }
 0x226   :  { %v641_v24 = vmax.f32 %v630_v21, 0.0 }
 0x22b   :  { %v632_v9 = vpop.f32.mrf.mxu0 }
 0x22c   :  { %v633_v19 = vadd.f32 %v632_v9, %v583_v14 }
 0x22e   :  { %v642_v23 = vmax.f32 %v633_v19, 0.0 }
 0x233   :  { %v635_v11 = vpop.f32.mrf.mxu0 }
 0x234   :  { %v636_v16 = vadd.f32 %v635_v11, %v588_v13 }
 0x236   :  { %v643_v22 = vmax.f32 %v636_v16, 0.0 }
 0x23b   :  { %v638_v15 = vpop.f32.mrf.mxu0 }
 0x23c   :  { %v639_v17 = vadd.f32 %v638_v15, %v593_v10 }
 0x23e   :  { %v644_v20 = vmax.f32 %v639_v17, 0.0 }
 0x240   :  { %682 = vmatpush.msra.mxu0 %v644_v20  ;;  %887 = vmatpush.msra.mxu1 %v644_v20 }
 0x242   :  { %683 = vmatpush.msra.mxu0 %v643_v22  ;;  %888 = vmatpush.msra.mxu1 %v643_v22 }
 0x244   :  { %684 = vmatpush.msra.mxu0 %v642_v23  ;;  %889 = vmatpush.msra.mxu1 %v642_v23 }
 0x246   :  { %685 = vmatpush.msra.mxu0 %v641_v24  ;;  %890 = vmatpush.msra.mxu1 %v641_v24 }
 0x247   :  { %858 = vmatmul.msk.f32.vlgmr.msra.gmra.mxu1 %vm661_vm2, %v1494_v30  ;;  %857 = vmatmul.msk.f32.vlgmr.msra.gmra.mxu0 %vm661_vm2, %v938_v0  ;;  %v712_v0 = vpop.permute.xlu1 %711  ;;  %v714_v30 = vpop.permute.xlu2 %713 }
 0x24f   :  { %859 = vmatmul.msk.f32.gmra.mxu1 %vm661_vm2, %v1499_v31  ;;  %v705_v43 = vpop.permute.xlu1 %704  ;;  %v709_v46 = vpop.permute.xlu2 %708 }
 0x257   :  { %860 = vmatmul.msk.f32.gmra.mxu1 %vm661_vm2, %v1508_v37 }
 0x2c4   :  { %v690_v25 = vpop.f32.mrf.mxu1  ;;  %v687_v35 = vpop.f32.mrf.mxu0 }
 0x2c5   :  { %v691_v38 = vadd.f32 %v690_v25, %v651_v32  ;;  %v688_v39 = vadd.f32 %v687_v35, %v647_v33 }
 0x2c7   :  { %v700_v41 = vmax.f32 %v691_v38, 0.0  ;;  %v699_v42 = vmax.f32 %v688_v39, 0.0 }
 0x2cc   :  { %v693_v28 = vpop.f32.mrf.mxu1 }
 0x2cd   :  { %v694_v31 = vadd.f32 %v693_v28, %v655_v29 }
 0x2cf   :  { %v701_v40 = vmax.f32 %v694_v31, 0.0 }
 0x2d4   :  { %v696_v34 = vpop.f32.mrf.mxu1 }
 0x2d5   :  { %v697_v36 = vadd.f32 %v696_v34, %v659_v26 }
 0x2d7   :  { %v702_v37 = vmax.f32 %v697_v36, 0.0 }
 0x2d9   :  { %731 = vmatpush.msra.mxu2 %v702_v37 }
 0x2db   :  { %732 = vmatpush.msra.mxu2 %v701_v40 }
 0x2dd   :  { %733 = vmatpush.msra.mxu2 %v700_v41 }
 0x2df   :  { %734 = vmatpush.msra.mxu2 %v699_v42 }
 0x2e0   :  { %861 = vmatmul.msk.f32.vlgmr.msra.gmra.mxu2 %vm661_vm2, %v712_v0 }
 0x2e8   :  { %862 = vmatmul.msk.f32.gmra.mxu2 %vm661_vm2, %v714_v30 }
 0x363   :  { %v736_v44 = vpop.f32.mrf.mxu2 }
 0x364   :  { %v737_v45 = vadd.f32 %v736_v44, %v705_v43 }
 0x366   :  { %743 = vst.msk [vmem:[%s1543_s3] sm:$0xff] %vm742_vm3, %v737_v45 }
 0x36b   :  { %v739_v47 = vpop.f32.mrf.mxu2 }
 0x36c   :  { %v740_v48 = vadd.f32 %v739_v47, %v709_v46 }
 0x36e   :  { %744 = vst.msk [vmem:[%s1543_s3 + $0x8] sm:$0xff] %vm742_vm3, %v740_v48 }

</bundles_post_ra>
